<compile_context>
chip_gen: v6e
topology: v6e:2x2x1
jax: 0.10.0
libtpu: 0.0.40
codegen_flags: <defaults>
</compile_context>

<pallas_src>
import functools

import jax
import jax.numpy as jnp
from jax.experimental import pallas as pl
from jax.experimental.pallas import tpu as pltpu


# ---------------------------------------------------------------------------
# Kernels
# ---------------------------------------------------------------------------
def _shortcut_kernel_flat(x_ref, o_ref, *, pad, wo, hwo, n_wo, n_h, n_ho):
    """Fast path (H, W powers of two): fully lane-dense, MXU-free.

    x_ref: (bt, C, H*W)        -- whole NCHW image flattened into the lane dim.
    o_ref: (bt, C + 2*pad, Ho*Wo)
    """
    x = x_ref[...]                                   # native dtype, no upcast
    bt, _, hw = x.shape
    lane = jax.lax.broadcasted_iota(jnp.int32, (1, 1, hw), 2)

    def compact_even(y, unit, n_steps):
        # Even-unit compaction butterfly: after step k every aligned group of
        # 4*unit*2**k lanes has its even `unit`-sized sub-blocks packed to the
        # front.  pltpu.roll runs on the XLU and the select on the VPU; both
        # are idle slots in this mem-bound kernel.
        for k in range(n_steps):                     # static unroll
            s = unit << k
            rolled = pltpu.roll(y, shift=hw - s, axis=2)   # rolled[q] = y[q + s]
            m = lane % (4 * s)
            y = jnp.where((m >= s) & (m < 2 * s), rolled, y)
        return y

    # Stage 1: even elements inside every W-wide row
    #          -> lanes [j*W, j*W + Wo) hold x[.., j, ::2].
    y = compact_even(x, 1, n_wo)
    # Stage 2: keep the leading Wo-wide half of every W-wide row, packed
    #          -> lanes [j*Wo, (j+1)*Wo) hold x[.., j, ::2] for all H rows.
    y = compact_even(y, wo, n_h)
    # Stage 3: keep even rows -> the first Ho*Wo lanes are the flattened
    #          (Ho, Wo) downsampled image, already in row-major output order.
    y = compact_even(y, wo, n_ho)

    data = y[..., :hwo].astype(o_ref.dtype)          # (bt, C, Ho*Wo)
    if pad > 0:
        z = jnp.zeros((bt, pad, hwo), dtype=o_ref.dtype)
        data = jnp.concatenate([z, data, z], axis=1)  # (bt, Cout, Ho*Wo)
    o_ref[...] = data                                 # single lane-dense store


def _shortcut_kernel_pairs(x_ref, o_ref, *, pad, wo, n_steps):
    """General fallback (any even H, W): H row-pairs folded into the lane dim.

    x_ref: (bt, C, Ho, 2*W)
    o_ref: (bt, C + 2*pad, Ho, Wo)   -- only Wo lanes wide (masked stores).
    """
    x = x_ref[...]
    bt, _, ho, w2 = x.shape
    lane = jax.lax.broadcasted_iota(jnp.int32, (1, 1, 1, w2), 3)
    y = x
    for k in range(n_steps):                         # static unroll
        s = 1 << k
        rolled = pltpu.roll(y, shift=w2 - s, axis=3)
        m = lane % (4 * s)
        y = jnp.where((m >= s) & (m < 2 * s), rolled, y)
    data = y[..., :wo].astype(o_ref.dtype)            # (bt, C, Ho, Wo)
    if pad > 0:
        z = jnp.zeros((bt, pad, ho, wo), dtype=o_ref.dtype)
        data = jnp.concatenate([z, data, z], axis=1)
    o_ref[...] = data


# ---------------------------------------------------------------------------
# Tiling / VMEM accounting helpers
# ---------------------------------------------------------------------------
def _round_up(n, m):
    return (n + m - 1) // m * m


def _padded_tile_bytes(block_shape, itemsize):
    """VMEM bytes of one buffer of `block_shape`, including the (sublane, lane)
    tiling padding of the last two dims."""
    sublane_mult = max(32 // itemsize, 8)             # f32:8, bf16:16, i8/fp8:32
    lead = 1
    for d in block_shape[:-2]:
        lead *= d
    sub = _round_up(block_shape[-2], sublane_mult)
    lane = _round_up(block_shape[-1], 128)
    return lead * sub * lane * itemsize


def _is_multi_core_chip():
    # v7x has 2 TensorCores per chip (a parallel grid axis can be sharded
    # across them); v5e/v6e have a single TC, where extra grid steps are pure
    # per-step overhead (~0.35us each) on a serial loop.
    try:
        kind = jax.devices()[0].device_kind.lower()
    except Exception:
        return False
    return ("v7" in kind) or ("7x" in kind)


def _pick_batch_tile(batch, per_sample_bytes, *, min_steps,
                     step_budget_bytes=10 * 1024 * 1024):
    """Largest divisor-of-batch tile whose padded in+out VMEM stays under the
    per-step budget (double-buffering doubles it, so 10 MiB -> ~20 MiB real,
    well under the scoped limit we request on every generation)."""
    bt = max(1, int(step_budget_bytes) // max(int(per_sample_bytes), 1))
    bt = min(bt, batch)
    if min_steps > 1 and batch >= min_steps:
        bt = min(bt, batch // min_steps)   # v7x only: give each TC >= 1 step
    bt = max(bt, 1)
    while batch % bt:
        bt -= 1
    return bt


# ---------------------------------------------------------------------------
# Builder (cached) + public wrapper
# ---------------------------------------------------------------------------
@functools.lru_cache(maxsize=None)
def _build_lambda_layer(shape, dtype_name, pad):
    B, C, H, W = shape
    dtype = jnp.dtype(dtype_name)
    itemsize = dtype.itemsize
    Ho, Wo = H // 2, W // 2
    Cout = C + 2 * pad

    pow2 = H >= 2 and W >= 2 and (H & (H - 1)) == 0 and (W & (W - 1)) == 0
    min_steps = 2 if (_is_multi_core_chip() and B >= 2) else 1

    if pow2:
        HW, HWo = H * W, Ho * Wo
        in_view, out_view = (B, C, HW), (B, Cout, HWo)
        kern = functools.partial(
            _shortcut_kernel_flat, pad=pad, wo=Wo, hwo=HWo,
            n_wo=max(W.bit_length() - 2, 0),   # log2(Wo)
            n_h=max(H.bit_length() - 1, 0),    # log2(H)
            n_ho=max(H.bit_length() - 2, 0))   # log2(Ho)
    else:
        in_view, out_view = (B, C, Ho, 2 * W), (B, Cout, Ho, Wo)
        kern = functools.partial(
            _shortcut_kernel_pairs, pad=pad, wo=Wo,
            n_steps=max(Wo - 1, 0).bit_length())   # ceil(log2(Wo))

    per_sample = (_padded_tile_bytes((1,) + in_view[1:], itemsize)
                  + _padded_tile_bytes((1,) + out_view[1:], itemsize))
    bt = _pick_batch_tile(B, per_sample, min_steps=min_steps)
    vmem_limit = max(32 * 1024 * 1024, 2 * bt * per_sample + (4 << 20))

    zeros_in = (0,) * (len(in_view) - 1)
    zeros_out = (0,) * (len(out_view) - 1)
    in_specs = [pl.BlockSpec((bt,) + in_view[1:], lambda b: (b,) + zeros_in)]
    out_specs = pl.BlockSpec((bt,) + out_view[1:], lambda b: (b,) + zeros_out)

    call = pl.pallas_call(
        kern,
        out_shape=jax.ShapeDtypeStruct(out_view, dtype),
        grid_spec=pltpu.PrefetchScalarGridSpec(
            num_scalar_prefetch=0,
            grid=(B // bt,),
            in_specs=in_specs,
            out_specs=out_specs),
        compiler_params=pltpu.CompilerParams(
            dimension_semantics=("parallel",),
            vmem_limit_bytes=int(vmem_limit)),
        cost_estimate=pl.CostEstimate(
            flops=0, transcendentals=0,
            bytes_accessed=int((B * C * H * W + B * Cout * Ho * Wo) * itemsize)),
    )

    def run(x):
        out = call(x.reshape(in_view))                # free contiguous views
        return out.reshape(B, Cout, Ho, Wo)

    return jax.jit(run)


def lambda_layer(x, pad_per_side=None):
    """Pallas implementation of the ResNet option-A shortcut lambda:
    x[:, :, ::2, ::2] zero-padded symmetrically along channels (NCHW)."""
    if x.ndim != 4:
        raise ValueError("lambda_layer expects an NCHW input.")
    B, C, H, W = x.shape
    if H % 2 or W % 2:
        raise ValueError("lambda_layer expects even spatial dims (H, W).")
    if pad_per_side is None:
        pad_per_side = C // 2            # planes = 2*C_in  =>  planes//4 == C_in//2
    return _build_lambda_layer((B, C, H, W), str(x.dtype), int(pad_per_side))(x)


# ---------------------------------------------------------------------------
if __name__ == "__main__":
    key = jax.random.PRNGKey(0)
    # Small NCHW input consistent with the module's usage in ResNet.
    x = jax.random.normal(key, (2, 4, 16, 16), dtype=jnp.float32)

    out = lambda_layer(x)
    out = jax.block_until_ready(out)

    # Pure-JAX reference of the wrapped lambda (strided slice + channel pad).
    pad = x.shape[1] // 2
    ref = jnp.pad(
        x[:, :, ::2, ::2],
        ((0, 0), (pad, pad), (0, 0), (0, 0)),
        mode="constant",
        constant_values=0.0,
    )
    assert out.shape == ref.shape, (out.shape, ref.shape)
    assert jnp.allclose(out, ref, atol=1e-6), "mismatch vs reference"

    print("KERNEL_OK")
</pallas_src>

<mosaic_0001>
module attributes {stable_mosaic.version = 11 : i64} {
  func.func @_shortcut_kernel_flat(%arg0: i32, %arg1: memref<2x4x256xf32, #tpu.memory_space<vmem>>, %arg2: memref<2x8x64xf32, #tpu.memory_space<vmem>>) attributes {dimension_semantics = [#tpu.dimension_semantics<parallel>], iteration_bounds = array<i64: 1>, scalar_prefetch = 0 : i64, scratch_operands = 0 : i64, tpu.core_type = #tpu.core_type<tc>, window_params = [{transform_indices = @transform_0, window_bounds = array<i64: 2, 4, 256>}, {transform_indices = @transform_1, window_bounds = array<i64: 2, 8, 64>}]} {
    %c0 = arith.constant 0 : index
    %c0_0 = arith.constant 0 : index
    %c0_1 = arith.constant 0 : index
    %0 = vector.load %arg1[%c0, %c0_0, %c0_1] : memref<2x4x256xf32, #tpu.memory_space<vmem>>, vector<2x4x256xf32>
    %1 = tpu.iota {dimensions = array<i32: 2>} : vector<1x1x256xi32>
    %c255_i32 = arith.constant 255 : i32
    %2 = tpu.dynamic_rotate %0 by %c255_i32 dim 2 : vector<2x4x256xf32>, i32 -> vector<2x4x256xf32>
    %c4_i32 = arith.constant 4 : i32
    %c0_i32 = arith.constant 0 : i32
    %3 = arith.cmpi eq, %c4_i32, %c0_i32 : i32
    %c1_i32 = arith.constant 1 : i32
    %4 = arith.select %3, %c1_i32, %c4_i32 : i32
    %5 = vector.broadcast %4 : i32 to vector<1x1x256xi32>
    %6 = arith.remsi %1, %5 : vector<1x1x256xi32>
    %c0_i32_2 = arith.constant 0 : i32
    %7 = vector.broadcast %c0_i32_2 : i32 to vector<1x1x256xi32>
    %8 = arith.cmpi ne, %6, %7 : vector<1x1x256xi32>
    %c0_i32_3 = arith.constant 0 : i32
    %9 = vector.broadcast %c0_i32_3 : i32 to vector<1x1x256xi32>
    %10 = arith.cmpi slt, %6, %9 : vector<1x1x256xi32>
    %c0_i32_4 = arith.constant 0 : i32
    %11 = arith.cmpi slt, %4, %c0_i32_4 : i32
    %12 = vector.broadcast %11 : i1 to vector<1x1x256xi1>
    %13 = vector.broadcast %12 : vector<1x1x256xi1> to vector<1x1x256xi1>
    %14 = arith.xori %10, %13 : vector<1x1x256xi1>
    %15 = arith.andi %14, %8 : vector<1x1x256xi1>
    %16 = vector.broadcast %4 : i32 to vector<1x1x256xi32>
    %17 = arith.addi %6, %16 : vector<1x1x256xi32>
    %18 = arith.select %15, %17, %6 : vector<1x1x256xi1>, vector<1x1x256xi32>
    %c1_i32_5 = arith.constant 1 : i32
    %19 = vector.broadcast %c1_i32_5 : i32 to vector<1x1x256xi32>
    %20 = arith.cmpi sge, %18, %19 : vector<1x1x256xi32>
    %c2_i32 = arith.constant 2 : i32
    %21 = vector.broadcast %c2_i32 : i32 to vector<1x1x256xi32>
    %22 = arith.cmpi slt, %18, %21 : vector<1x1x256xi32>
    %23 = arith.andi %20, %22 : vector<1x1x256xi1>
    %24 = vector.shape_cast %23 : vector<1x1x256xi1> to vector<1x1x256xi1>
    %25 = vector.broadcast %24 : vector<1x1x256xi1> to vector<2x4x256xi1>
    %26 = arith.select %25, %2, %0 : vector<2x4x256xi1>, vector<2x4x256xf32>
    %c254_i32 = arith.constant 254 : i32
    %27 = tpu.dynamic_rotate %26 by %c254_i32 dim 2 : vector<2x4x256xf32>, i32 -> vector<2x4x256xf32>
    %c8_i32 = arith.constant 8 : i32
    %c0_i32_6 = arith.constant 0 : i32
    %28 = arith.cmpi eq, %c8_i32, %c0_i32_6 : i32
    %c1_i32_7 = arith.constant 1 : i32
    %29 = arith.select %28, %c1_i32_7, %c8_i32 : i32
    %30 = vector.broadcast %29 : i32 to vector<1x1x256xi32>
    %31 = arith.remsi %1, %30 : vector<1x1x256xi32>
    %c0_i32_8 = arith.constant 0 : i32
    %32 = vector.broadcast %c0_i32_8 : i32 to vector<1x1x256xi32>
    %33 = arith.cmpi ne, %31, %32 : vector<1x1x256xi32>
    %c0_i32_9 = arith.constant 0 : i32
    %34 = vector.broadcast %c0_i32_9 : i32 to vector<1x1x256xi32>
    %35 = arith.cmpi slt, %31, %34 : vector<1x1x256xi32>
    %c0_i32_10 = arith.constant 0 : i32
    %36 = arith.cmpi slt, %29, %c0_i32_10 : i32
    %37 = vector.broadcast %36 : i1 to vector<1x1x256xi1>
    %38 = vector.broadcast %37 : vector<1x1x256xi1> to vector<1x1x256xi1>
    %39 = arith.xori %35, %38 : vector<1x1x256xi1>
    %40 = arith.andi %39, %33 : vector<1x1x256xi1>
    %41 = vector.broadcast %29 : i32 to vector<1x1x256xi32>
    %42 = arith.addi %31, %41 : vector<1x1x256xi32>
    %43 = arith.select %40, %42, %31 : vector<1x1x256xi1>, vector<1x1x256xi32>
    %c2_i32_11 = arith.constant 2 : i32
    %44 = vector.broadcast %c2_i32_11 : i32 to vector<1x1x256xi32>
    %45 = arith.cmpi sge, %43, %44 : vector<1x1x256xi32>
    %c4_i32_12 = arith.constant 4 : i32
    %46 = vector.broadcast %c4_i32_12 : i32 to vector<1x1x256xi32>
    %47 = arith.cmpi slt, %43, %46 : vector<1x1x256xi32>
    %48 = arith.andi %45, %47 : vector<1x1x256xi1>
    %49 = vector.shape_cast %48 : vector<1x1x256xi1> to vector<1x1x256xi1>
    %50 = vector.broadcast %49 : vector<1x1x256xi1> to vector<2x4x256xi1>
    %51 = arith.select %50, %27, %26 : vector<2x4x256xi1>, vector<2x4x256xf32>
    %c252_i32 = arith.constant 252 : i32
    %52 = tpu.dynamic_rotate %51 by %c252_i32 dim 2 : vector<2x4x256xf32>, i32 -> vector<2x4x256xf32>
    %c16_i32 = arith.constant 16 : i32
    %c0_i32_13 = arith.constant 0 : i32
    %53 = arith.cmpi eq, %c16_i32, %c0_i32_13 : i32
    %c1_i32_14 = arith.constant 1 : i32
    %54 = arith.select %53, %c1_i32_14, %c16_i32 : i32
    %55 = vector.broadcast %54 : i32 to vector<1x1x256xi32>
    %56 = arith.remsi %1, %55 : vector<1x1x256xi32>
    %c0_i32_15 = arith.constant 0 : i32
    %57 = vector.broadcast %c0_i32_15 : i32 to vector<1x1x256xi32>
    %58 = arith.cmpi ne, %56, %57 : vector<1x1x256xi32>
    %c0_i32_16 = arith.constant 0 : i32
    %59 = vector.broadcast %c0_i32_16 : i32 to vector<1x1x256xi32>
    %60 = arith.cmpi slt, %56, %59 : vector<1x1x256xi32>
    %c0_i32_17 = arith.constant 0 : i32
    %61 = arith.cmpi slt, %54, %c0_i32_17 : i32
    %62 = vector.broadcast %61 : i1 to vector<1x1x256xi1>
    %63 = vector.broadcast %62 : vector<1x1x256xi1> to vector<1x1x256xi1>
    %64 = arith.xori %60, %63 : vector<1x1x256xi1>
    %65 = arith.andi %64, %58 : vector<1x1x256xi1>
    %66 = vector.broadcast %54 : i32 to vector<1x1x256xi32>
    %67 = arith.addi %56, %66 : vector<1x1x256xi32>
    %68 = arith.select %65, %67, %56 : vector<1x1x256xi1>, vector<1x1x256xi32>
    %c4_i32_18 = arith.constant 4 : i32
    %69 = vector.broadcast %c4_i32_18 : i32 to vector<1x1x256xi32>
    %70 = arith.cmpi sge, %68, %69 : vector<1x1x256xi32>
    %c8_i32_19 = arith.constant 8 : i32
    %71 = vector.broadcast %c8_i32_19 : i32 to vector<1x1x256xi32>
    %72 = arith.cmpi slt, %68, %71 : vector<1x1x256xi32>
    %73 = arith.andi %70, %72 : vector<1x1x256xi1>
    %74 = vector.shape_cast %73 : vector<1x1x256xi1> to vector<1x1x256xi1>
    %75 = vector.broadcast %74 : vector<1x1x256xi1> to vector<2x4x256xi1>
    %76 = arith.select %75, %52, %51 : vector<2x4x256xi1>, vector<2x4x256xf32>
    %c248_i32 = arith.constant 248 : i32
    %77 = tpu.dynamic_rotate %76 by %c248_i32 dim 2 : vector<2x4x256xf32>, i32 -> vector<2x4x256xf32>
    %c32_i32 = arith.constant 32 : i32
    %c0_i32_20 = arith.constant 0 : i32
    %78 = arith.cmpi eq, %c32_i32, %c0_i32_20 : i32
    %c1_i32_21 = arith.constant 1 : i32
    %79 = arith.select %78, %c1_i32_21, %c32_i32 : i32
    %80 = vector.broadcast %79 : i32 to vector<1x1x256xi32>
    %81 = arith.remsi %1, %80 : vector<1x1x256xi32>
    %c0_i32_22 = arith.constant 0 : i32
    %82 = vector.broadcast %c0_i32_22 : i32 to vector<1x1x256xi32>
    %83 = arith.cmpi ne, %81, %82 : vector<1x1x256xi32>
    %c0_i32_23 = arith.constant 0 : i32
    %84 = vector.broadcast %c0_i32_23 : i32 to vector<1x1x256xi32>
    %85 = arith.cmpi slt, %81, %84 : vector<1x1x256xi32>
    %c0_i32_24 = arith.constant 0 : i32
    %86 = arith.cmpi slt, %79, %c0_i32_24 : i32
    %87 = vector.broadcast %86 : i1 to vector<1x1x256xi1>
    %88 = vector.broadcast %87 : vector<1x1x256xi1> to vector<1x1x256xi1>
    %89 = arith.xori %85, %88 : vector<1x1x256xi1>
    %90 = arith.andi %89, %83 : vector<1x1x256xi1>
    %91 = vector.broadcast %79 : i32 to vector<1x1x256xi32>
    %92 = arith.addi %81, %91 : vector<1x1x256xi32>
    %93 = arith.select %90, %92, %81 : vector<1x1x256xi1>, vector<1x1x256xi32>
    %c8_i32_25 = arith.constant 8 : i32
    %94 = vector.broadcast %c8_i32_25 : i32 to vector<1x1x256xi32>
    %95 = arith.cmpi sge, %93, %94 : vector<1x1x256xi32>
    %c16_i32_26 = arith.constant 16 : i32
    %96 = vector.broadcast %c16_i32_26 : i32 to vector<1x1x256xi32>
    %97 = arith.cmpi slt, %93, %96 : vector<1x1x256xi32>
    %98 = arith.andi %95, %97 : vector<1x1x256xi1>
    %99 = vector.shape_cast %98 : vector<1x1x256xi1> to vector<1x1x256xi1>
    %100 = vector.broadcast %99 : vector<1x1x256xi1> to vector<2x4x256xi1>
    %101 = arith.select %100, %77, %76 : vector<2x4x256xi1>, vector<2x4x256xf32>
    %c240_i32 = arith.constant 240 : i32
    %102 = tpu.dynamic_rotate %101 by %c240_i32 dim 2 : vector<2x4x256xf32>, i32 -> vector<2x4x256xf32>
    %c64_i32 = arith.constant 64 : i32
    %c0_i32_27 = arith.constant 0 : i32
    %103 = arith.cmpi eq, %c64_i32, %c0_i32_27 : i32
    %c1_i32_28 = arith.constant 1 : i32
    %104 = arith.select %103, %c1_i32_28, %c64_i32 : i32
    %105 = vector.broadcast %104 : i32 to vector<1x1x256xi32>
    %106 = arith.remsi %1, %105 : vector<1x1x256xi32>
    %c0_i32_29 = arith.constant 0 : i32
    %107 = vector.broadcast %c0_i32_29 : i32 to vector<1x1x256xi32>
    %108 = arith.cmpi ne, %106, %107 : vector<1x1x256xi32>
    %c0_i32_30 = arith.constant 0 : i32
    %109 = vector.broadcast %c0_i32_30 : i32 to vector<1x1x256xi32>
    %110 = arith.cmpi slt, %106, %109 : vector<1x1x256xi32>
    %c0_i32_31 = arith.constant 0 : i32
    %111 = arith.cmpi slt, %104, %c0_i32_31 : i32
    %112 = vector.broadcast %111 : i1 to vector<1x1x256xi1>
    %113 = vector.broadcast %112 : vector<1x1x256xi1> to vector<1x1x256xi1>
    %114 = arith.xori %110, %113 : vector<1x1x256xi1>
    %115 = arith.andi %114, %108 : vector<1x1x256xi1>
    %116 = vector.broadcast %104 : i32 to vector<1x1x256xi32>
    %117 = arith.addi %106, %116 : vector<1x1x256xi32>
    %118 = arith.select %115, %117, %106 : vector<1x1x256xi1>, vector<1x1x256xi32>
    %c16_i32_32 = arith.constant 16 : i32
    %119 = vector.broadcast %c16_i32_32 : i32 to vector<1x1x256xi32>
    %120 = arith.cmpi sge, %118, %119 : vector<1x1x256xi32>
    %c32_i32_33 = arith.constant 32 : i32
    %121 = vector.broadcast %c32_i32_33 : i32 to vector<1x1x256xi32>
    %122 = arith.cmpi slt, %118, %121 : vector<1x1x256xi32>
    %123 = arith.andi %120, %122 : vector<1x1x256xi1>
    %124 = vector.shape_cast %123 : vector<1x1x256xi1> to vector<1x1x256xi1>
    %125 = vector.broadcast %124 : vector<1x1x256xi1> to vector<2x4x256xi1>
    %126 = arith.select %125, %102, %101 : vector<2x4x256xi1>, vector<2x4x256xf32>
    %c224_i32 = arith.constant 224 : i32
    %127 = tpu.dynamic_rotate %126 by %c224_i32 dim 2 : vector<2x4x256xf32>, i32 -> vector<2x4x256xf32>
    %c128_i32 = arith.constant 128 : i32
    %c0_i32_34 = arith.constant 0 : i32
    %128 = arith.cmpi eq, %c128_i32, %c0_i32_34 : i32
    %c1_i32_35 = arith.constant 1 : i32
    %129 = arith.select %128, %c1_i32_35, %c128_i32 : i32
    %130 = vector.broadcast %129 : i32 to vector<1x1x256xi32>
    %131 = arith.remsi %1, %130 : vector<1x1x256xi32>
    %c0_i32_36 = arith.constant 0 : i32
    %132 = vector.broadcast %c0_i32_36 : i32 to vector<1x1x256xi32>
    %133 = arith.cmpi ne, %131, %132 : vector<1x1x256xi32>
    %c0_i32_37 = arith.constant 0 : i32
    %134 = vector.broadcast %c0_i32_37 : i32 to vector<1x1x256xi32>
    %135 = arith.cmpi slt, %131, %134 : vector<1x1x256xi32>
    %c0_i32_38 = arith.constant 0 : i32
    %136 = arith.cmpi slt, %129, %c0_i32_38 : i32
    %137 = vector.broadcast %136 : i1 to vector<1x1x256xi1>
    %138 = vector.broadcast %137 : vector<1x1x256xi1> to vector<1x1x256xi1>
    %139 = arith.xori %135, %138 : vector<1x1x256xi1>
    %140 = arith.andi %139, %133 : vector<1x1x256xi1>
    %141 = vector.broadcast %129 : i32 to vector<1x1x256xi32>
    %142 = arith.addi %131, %141 : vector<1x1x256xi32>
    %143 = arith.select %140, %142, %131 : vector<1x1x256xi1>, vector<1x1x256xi32>
    %c32_i32_39 = arith.constant 32 : i32
    %144 = vector.broadcast %c32_i32_39 : i32 to vector<1x1x256xi32>
    %145 = arith.cmpi sge, %143, %144 : vector<1x1x256xi32>
    %c64_i32_40 = arith.constant 64 : i32
    %146 = vector.broadcast %c64_i32_40 : i32 to vector<1x1x256xi32>
    %147 = arith.cmpi slt, %143, %146 : vector<1x1x256xi32>
    %148 = arith.andi %145, %147 : vector<1x1x256xi1>
    %149 = vector.shape_cast %148 : vector<1x1x256xi1> to vector<1x1x256xi1>
    %150 = vector.broadcast %149 : vector<1x1x256xi1> to vector<2x4x256xi1>
    %151 = arith.select %150, %127, %126 : vector<2x4x256xi1>, vector<2x4x256xf32>
    %c192_i32 = arith.constant 192 : i32
    %152 = tpu.dynamic_rotate %151 by %c192_i32 dim 2 : vector<2x4x256xf32>, i32 -> vector<2x4x256xf32>
    %c256_i32 = arith.constant 256 : i32
    %c0_i32_41 = arith.constant 0 : i32
    %153 = arith.cmpi eq, %c256_i32, %c0_i32_41 : i32
    %c1_i32_42 = arith.constant 1 : i32
    %154 = arith.select %153, %c1_i32_42, %c256_i32 : i32
    %155 = vector.broadcast %154 : i32 to vector<1x1x256xi32>
    %156 = arith.remsi %1, %155 : vector<1x1x256xi32>
    %c0_i32_43 = arith.constant 0 : i32
    %157 = vector.broadcast %c0_i32_43 : i32 to vector<1x1x256xi32>
    %158 = arith.cmpi ne, %156, %157 : vector<1x1x256xi32>
    %c0_i32_44 = arith.constant 0 : i32
    %159 = vector.broadcast %c0_i32_44 : i32 to vector<1x1x256xi32>
    %160 = arith.cmpi slt, %156, %159 : vector<1x1x256xi32>
    %c0_i32_45 = arith.constant 0 : i32
    %161 = arith.cmpi slt, %154, %c0_i32_45 : i32
    %162 = vector.broadcast %161 : i1 to vector<1x1x256xi1>
    %163 = vector.broadcast %162 : vector<1x1x256xi1> to vector<1x1x256xi1>
    %164 = arith.xori %160, %163 : vector<1x1x256xi1>
    %165 = arith.andi %164, %158 : vector<1x1x256xi1>
    %166 = vector.broadcast %154 : i32 to vector<1x1x256xi32>
    %167 = arith.addi %156, %166 : vector<1x1x256xi32>
    %168 = arith.select %165, %167, %156 : vector<1x1x256xi1>, vector<1x1x256xi32>
    %c64_i32_46 = arith.constant 64 : i32
    %169 = vector.broadcast %c64_i32_46 : i32 to vector<1x1x256xi32>
    %170 = arith.cmpi sge, %168, %169 : vector<1x1x256xi32>
    %c128_i32_47 = arith.constant 128 : i32
    %171 = vector.broadcast %c128_i32_47 : i32 to vector<1x1x256xi32>
    %172 = arith.cmpi slt, %168, %171 : vector<1x1x256xi32>
    %173 = arith.andi %170, %172 : vector<1x1x256xi1>
    %174 = vector.shape_cast %173 : vector<1x1x256xi1> to vector<1x1x256xi1>
    %175 = vector.broadcast %174 : vector<1x1x256xi1> to vector<2x4x256xi1>
    %176 = arith.select %175, %152, %151 : vector<2x4x256xi1>, vector<2x4x256xf32>
    %c248_i32_48 = arith.constant 248 : i32
    %177 = tpu.dynamic_rotate %176 by %c248_i32_48 dim 2 : vector<2x4x256xf32>, i32 -> vector<2x4x256xf32>
    %c32_i32_49 = arith.constant 32 : i32
    %c0_i32_50 = arith.constant 0 : i32
    %178 = arith.cmpi eq, %c32_i32_49, %c0_i32_50 : i32
    %c1_i32_51 = arith.constant 1 : i32
    %179 = arith.select %178, %c1_i32_51, %c32_i32_49 : i32
    %180 = vector.broadcast %179 : i32 to vector<1x1x256xi32>
    %181 = arith.remsi %1, %180 : vector<1x1x256xi32>
    %c0_i32_52 = arith.constant 0 : i32
    %182 = vector.broadcast %c0_i32_52 : i32 to vector<1x1x256xi32>
    %183 = arith.cmpi ne, %181, %182 : vector<1x1x256xi32>
    %c0_i32_53 = arith.constant 0 : i32
    %184 = vector.broadcast %c0_i32_53 : i32 to vector<1x1x256xi32>
    %185 = arith.cmpi slt, %181, %184 : vector<1x1x256xi32>
    %c0_i32_54 = arith.constant 0 : i32
    %186 = arith.cmpi slt, %179, %c0_i32_54 : i32
    %187 = vector.broadcast %186 : i1 to vector<1x1x256xi1>
    %188 = vector.broadcast %187 : vector<1x1x256xi1> to vector<1x1x256xi1>
    %189 = arith.xori %185, %188 : vector<1x1x256xi1>
    %190 = arith.andi %189, %183 : vector<1x1x256xi1>
    %191 = vector.broadcast %179 : i32 to vector<1x1x256xi32>
    %192 = arith.addi %181, %191 : vector<1x1x256xi32>
    %193 = arith.select %190, %192, %181 : vector<1x1x256xi1>, vector<1x1x256xi32>
    %c8_i32_55 = arith.constant 8 : i32
    %194 = vector.broadcast %c8_i32_55 : i32 to vector<1x1x256xi32>
    %195 = arith.cmpi sge, %193, %194 : vector<1x1x256xi32>
    %c16_i32_56 = arith.constant 16 : i32
    %196 = vector.broadcast %c16_i32_56 : i32 to vector<1x1x256xi32>
    %197 = arith.cmpi slt, %193, %196 : vector<1x1x256xi32>
    %198 = arith.andi %195, %197 : vector<1x1x256xi1>
    %199 = vector.shape_cast %198 : vector<1x1x256xi1> to vector<1x1x256xi1>
    %200 = vector.broadcast %199 : vector<1x1x256xi1> to vector<2x4x256xi1>
    %201 = arith.select %200, %177, %176 : vector<2x4x256xi1>, vector<2x4x256xf32>
    %c240_i32_57 = arith.constant 240 : i32
    %202 = tpu.dynamic_rotate %201 by %c240_i32_57 dim 2 : vector<2x4x256xf32>, i32 -> vector<2x4x256xf32>
    %c64_i32_58 = arith.constant 64 : i32
    %c0_i32_59 = arith.constant 0 : i32
    %203 = arith.cmpi eq, %c64_i32_58, %c0_i32_59 : i32
    %c1_i32_60 = arith.constant 1 : i32
    %204 = arith.select %203, %c1_i32_60, %c64_i32_58 : i32
    %205 = vector.broadcast %204 : i32 to vector<1x1x256xi32>
    %206 = arith.remsi %1, %205 : vector<1x1x256xi32>
    %c0_i32_61 = arith.constant 0 : i32
    %207 = vector.broadcast %c0_i32_61 : i32 to vector<1x1x256xi32>
    %208 = arith.cmpi ne, %206, %207 : vector<1x1x256xi32>
    %c0_i32_62 = arith.constant 0 : i32
    %209 = vector.broadcast %c0_i32_62 : i32 to vector<1x1x256xi32>
    %210 = arith.cmpi slt, %206, %209 : vector<1x1x256xi32>
    %c0_i32_63 = arith.constant 0 : i32
    %211 = arith.cmpi slt, %204, %c0_i32_63 : i32
    %212 = vector.broadcast %211 : i1 to vector<1x1x256xi1>
    %213 = vector.broadcast %212 : vector<1x1x256xi1> to vector<1x1x256xi1>
    %214 = arith.xori %210, %213 : vector<1x1x256xi1>
    %215 = arith.andi %214, %208 : vector<1x1x256xi1>
    %216 = vector.broadcast %204 : i32 to vector<1x1x256xi32>
    %217 = arith.addi %206, %216 : vector<1x1x256xi32>
    %218 = arith.select %215, %217, %206 : vector<1x1x256xi1>, vector<1x1x256xi32>
    %c16_i32_64 = arith.constant 16 : i32
    %219 = vector.broadcast %c16_i32_64 : i32 to vector<1x1x256xi32>
    %220 = arith.cmpi sge, %218, %219 : vector<1x1x256xi32>
    %c32_i32_65 = arith.constant 32 : i32
    %221 = vector.broadcast %c32_i32_65 : i32 to vector<1x1x256xi32>
    %222 = arith.cmpi slt, %218, %221 : vector<1x1x256xi32>
    %223 = arith.andi %220, %222 : vector<1x1x256xi1>
    %224 = vector.shape_cast %223 : vector<1x1x256xi1> to vector<1x1x256xi1>
    %225 = vector.broadcast %224 : vector<1x1x256xi1> to vector<2x4x256xi1>
    %226 = arith.select %225, %202, %201 : vector<2x4x256xi1>, vector<2x4x256xf32>
    %c224_i32_66 = arith.constant 224 : i32
    %227 = tpu.dynamic_rotate %226 by %c224_i32_66 dim 2 : vector<2x4x256xf32>, i32 -> vector<2x4x256xf32>
    %c128_i32_67 = arith.constant 128 : i32
    %c0_i32_68 = arith.constant 0 : i32
    %228 = arith.cmpi eq, %c128_i32_67, %c0_i32_68 : i32
    %c1_i32_69 = arith.constant 1 : i32
    %229 = arith.select %228, %c1_i32_69, %c128_i32_67 : i32
    %230 = vector.broadcast %229 : i32 to vector<1x1x256xi32>
    %231 = arith.remsi %1, %230 : vector<1x1x256xi32>
    %c0_i32_70 = arith.constant 0 : i32
    %232 = vector.broadcast %c0_i32_70 : i32 to vector<1x1x256xi32>
    %233 = arith.cmpi ne, %231, %232 : vector<1x1x256xi32>
    %c0_i32_71 = arith.constant 0 : i32
    %234 = vector.broadcast %c0_i32_71 : i32 to vector<1x1x256xi32>
    %235 = arith.cmpi slt, %231, %234 : vector<1x1x256xi32>
    %c0_i32_72 = arith.constant 0 : i32
    %236 = arith.cmpi slt, %229, %c0_i32_72 : i32
    %237 = vector.broadcast %236 : i1 to vector<1x1x256xi1>
    %238 = vector.broadcast %237 : vector<1x1x256xi1> to vector<1x1x256xi1>
    %239 = arith.xori %235, %238 : vector<1x1x256xi1>
    %240 = arith.andi %239, %233 : vector<1x1x256xi1>
    %241 = vector.broadcast %229 : i32 to vector<1x1x256xi32>
    %242 = arith.addi %231, %241 : vector<1x1x256xi32>
    %243 = arith.select %240, %242, %231 : vector<1x1x256xi1>, vector<1x1x256xi32>
    %c32_i32_73 = arith.constant 32 : i32
    %244 = vector.broadcast %c32_i32_73 : i32 to vector<1x1x256xi32>
    %245 = arith.cmpi sge, %243, %244 : vector<1x1x256xi32>
    %c64_i32_74 = arith.constant 64 : i32
    %246 = vector.broadcast %c64_i32_74 : i32 to vector<1x1x256xi32>
    %247 = arith.cmpi slt, %243, %246 : vector<1x1x256xi32>
    %248 = arith.andi %245, %247 : vector<1x1x256xi1>
    %249 = vector.shape_cast %248 : vector<1x1x256xi1> to vector<1x1x256xi1>
    %250 = vector.broadcast %249 : vector<1x1x256xi1> to vector<2x4x256xi1>
    %251 = arith.select %250, %227, %226 : vector<2x4x256xi1>, vector<2x4x256xf32>
    %252 = vector.extract_strided_slice %251 {offsets = [0, 0, 0], sizes = [2, 4, 64], strides = [1, 1, 1]} : vector<2x4x256xf32> to vector<2x4x64xf32>
    %cst = arith.constant 0.000000e+00 : f32
    %253 = vector.broadcast %cst : f32 to vector<2x2x64xf32>
    %254 = tpu.concatenate %253, %252, %253 in 1 : vector<2x2x64xf32>, vector<2x4x64xf32>, vector<2x2x64xf32> -> vector<2x8x64xf32>
    %c0_75 = arith.constant 0 : index
    %c0_76 = arith.constant 0 : index
    %c0_77 = arith.constant 0 : index
    %255 = vector.load %arg2[%c0_75, %c0_76, %c0_77] : memref<2x8x64xf32, #tpu.memory_space<vmem>>, vector<2x8x64xf32>
    tpu.vector_store %arg2[%c0_75, %c0_76, %c0_77], %254 {strides = array<i32>} : memref<2x8x64xf32, #tpu.memory_space<vmem>>, vector<2x8x64xf32>,
    return
  }
  func.func @transform_0(%arg0: i32) -> (i32, i32, i32) {
    %c0_i32 = arith.constant 0 : i32
    %c0_i32_0 = arith.constant 0 : i32
    %c0_i32_1 = arith.constant 0 : i32
    return %arg0, %c0_i32, %c0_i32_0 : i32, i32, i32
  }
  func.func @transform_1(%arg0: i32) -> (i32, i32, i32) {
    %c0_i32 = arith.constant 0 : i32
    %c0_i32_0 = arith.constant 0 : i32
    %c0_i32_1 = arith.constant 0 : i32
    return %arg0, %c0_i32, %c0_i32_0 : i32, i32, i32
  }
}

</mosaic_0001>

<bundles_post_ra>
// kernel: run.1
= control target key start
LH: loop header
LB: loop body
LE: loop exit
PB: predicated region body
PF: predicated region fallthrough
CT: control target
= control target key end

     0   :  { %s448_s10 = smov 127   ;;  %v10_v4 = vlaneseq  ;;  %s450_s11 = smov 124   ;;  %s726_s0 = inlined_call_operand.vmem [shape: f32[2,4,256], index: 0, kind: input, shape index: {}]   ;;  %s727_s1 = inlined_call_operand.vmem [shape: f32[2,8,64], index: 1, kind: output, shape index: {}]  }
   0x1   :  { %v8_v0 = vld [vmem:[%s726_s0] sm:$0xff]  ;;  %v9_v1 = vld [vmem:[%s726_s0 + $0x8] sm:$0xff]  ;;  %s449_s0 = smov 126   ;;  %s451_s12 = smov 120  }
   0x2   :  { %19 = vrot.lane.b32.xlu0 %v8_v0, %s448_s10  ;;  %v15_v2 = vcombine.high %v8_v0, %v8_v0  ;;  %v16_v3 = vcombine.high %v9_v1, %v9_v1  ;;  %v471_v5 = vand.u32 127, %v10_v4  ;;  %s452_s13 = smov 112   ;;  %s453_s14 = smov 96  }
   0x3   :  { %s454_s15 = smov 64  }
   0x4   :  { %23 = vrot.lane.b32.xlu1 %v15_v2, %s448_s10  ;;  %v36_v6 = vand.u32 3, %v471_v5  ;;  %v475_v7 = vadd.s32 128, %v471_v5  ;;  %vm27_vm2 = vcmp.lt.s32.totalorder %v471_v5, 127  ;;  %v87_v25 = vand.u32 7, %v471_v5 }
   0x5   :  { %vm78_vm9 = vcmp.lt.s32.totalorder %v471_v5, 126  ;;  %v138_v42 = vand.u32 15, %v471_v5  ;;  %v189_v59 = vand.u32 31, %v471_v5  ;;  %v240_v13 = vand.u32 63, %v471_v5 }
   0x6   :  { %21 = vrot.lane.b32.xlu0 %v9_v1, %s448_s10  ;;  %vm477_vm0 = vcmp.ge.s32.totalorder %v36_v6, 1  ;;  %vm481_vm1 = vcmp.lt.s32.totalorder %v36_v6, 2  ;;  %v43_v10 = vand.u32 3, %v475_v7  ;;  %vm512_vm7 = vcmp.ge.s32.totalorder %v87_v25, 2 }
   0x7   :  { %vm60_vm3 = vmand %vm477_vm0, %vm481_vm1  ;;  %vm516_vm8 = vcmp.lt.s32.totalorder %v87_v25, 4  ;;  %v94_v29 = vand.u32 7, %v475_v7  ;;  %vm541_vm14 = vcmp.ge.s32.totalorder %v138_v42, 4  ;;  %vm545_vm15 = vcmp.lt.s32.totalorder %v138_v42, 8 }
   0x8   :  { %25 = vrot.lane.b32.xlu1 %v16_v3, %s448_s10  ;;  %vm491_vm4 = vcmp.ge.s32.totalorder %v43_v10, 1  ;;  %vm495_vm5 = vcmp.lt.s32.totalorder %v43_v10, 2  ;;  %vm111_vm10 = vmand %vm512_vm7, %vm516_vm8  ;;  %v145_v46 = vand.u32 15, %v475_v7  ;;  %vm129_vm0 = vcmp.lt.s32.totalorder %v471_v5, 124 }
   0x9   :  { %vm61_vm6 = vmand %vm491_vm4, %vm495_vm5  ;;  %vm526_vm11 = vcmp.ge.s32.totalorder %v94_v29, 2  ;;  %vm110_vm12 = vcmp.lt.s32.totalorder %v94_v29, 4  ;;  %vm209_vm5 = vcmp.ge.s32.totalorder %v189_v59, 8  ;;  %v196_v61 = vand.u32 31, %v475_v7 }
   0xa   :  { %vm112_vm13 = vmand %vm526_vm11, %vm110_vm12  ;;  %vm180_vm7 = vcmp.lt.s32.totalorder %v471_v5, 120  ;;  %vm260_vm12 = vcmp.ge.s32.totalorder %v240_v13, 16 }
   0xb   :  { %vm162_vm1 = vmand %vm541_vm14, %vm545_vm15  ;;  %vm231_vm14 = vcmp.lt.s32.totalorder %v471_v5, 112 }
  0x74   :  { %v20_v11 = vpop.permute.xlu0 %19 }
  0x76   :  { %v24_v12 = vpop.permute.xlu1 %23 }
  0x77   :  { %v28_v15 = vsel %vm27_vm2, %v20_v11, %v24_v12  ;;  %v30_v18 = vsel %vm27_vm2, %v24_v12, %v20_v11 }
  0x78   :  { %v66_v16 = vsel %vm60_vm3, %v28_v15, %v8_v0  ;;  %v22_v17 = vpop.permute.xlu0 %21  ;;  %v67_v21 = vsel %vm61_vm6, %v30_v18, %v15_v2  ;;  %v247_v15 = vand.u32 63, %v475_v7 }
  0x79   :  { %70 = vrot.lane.b32.xlu0 %v66_v16, %s449_s0 }
  0x7a   :  { %v26_v19 = vpop.permute.xlu1 %25 }
  0x7b   :  { %v29_v20 = vsel %vm27_vm2, %v22_v17, %v26_v19  ;;  %v31_v23 = vsel %vm27_vm2, %v26_v19, %v22_v17  ;;  %vm555_vm2 = vcmp.ge.s32.totalorder %v145_v46, 4 }
  0x7c   :  { %v68_v22 = vsel %vm60_vm3, %v29_v20, %v9_v1  ;;  %v69_v24 = vsel %vm61_vm6, %v31_v23, %v16_v3  ;;  %vm161_vm3 = vcmp.lt.s32.totalorder %v145_v46, 8  ;;  %vm211_vm6 = vcmp.lt.s32.totalorder %v189_v59, 16 }
  0x7d   :  { %74 = vrot.lane.b32.xlu0 %v67_v21, %s449_s0  ;;  %72 = vrot.lane.b32.xlu1 %v68_v22, %s449_s0  ;;  %vm163_vm4 = vmand %vm555_vm2, %vm161_vm3  ;;  %vm311_vm3 = vcmp.ge.s32.totalorder %v471_v5, 32 }
  0x7e   :  { %vm576_vm8 = vmand %vm209_vm5, %vm211_vm6  ;;  %vm282_vm5 = vcmp.lt.s32.totalorder %v471_v5, 96 }
  0x81   :  { %76 = vrot.lane.b32.xlu1 %v69_v24, %s449_s0 }
  0xeb   :  { %v71_v26 = vpop.permute.xlu0 %70 }
  0xef   :  { %v75_v30 = vpop.permute.xlu0 %74  ;;  %v73_v31 = vpop.permute.xlu1 %72 }
  0xf0   :  { %v79_v33 = vsel %vm78_vm9, %v71_v26, %v75_v30  ;;  %v81_v35 = vsel %vm78_vm9, %v75_v30, %v71_v26  ;;  %v298_v30 = vand.u32 127, %v475_v7 }
  0xf1   :  { %v117_v34 = vsel %vm111_vm10, %v79_v33, %v66_v16  ;;  %v118_v38 = vsel %vm112_vm13, %v81_v35, %v67_v21 }
  0xf2   :  { %121 = vrot.lane.b32.xlu0 %v117_v34, %s450_s11 }
  0xf3   :  { %v77_v36 = vpop.permute.xlu1 %76 }
  0xf4   :  { %v80_v37 = vsel %vm78_vm9, %v73_v31, %v77_v36  ;;  %v82_v40 = vsel %vm78_vm9, %v77_v36, %v73_v31  ;;  %vm210_vm9 = vcmp.ge.s32.totalorder %v196_v61, 8 }
  0xf5   :  { %v119_v39 = vsel %vm111_vm10, %v80_v37, %v68_v22  ;;  %v120_v41 = vsel %vm112_vm13, %v82_v40, %v69_v24  ;;  %vm212_vm10 = vcmp.lt.s32.totalorder %v196_v61, 16  ;;  %vm262_vm13 = vcmp.lt.s32.totalorder %v240_v13, 32 }
  0xf6   :  { %125 = vrot.lane.b32.xlu0 %v118_v38, %s450_s11  ;;  %123 = vrot.lane.b32.xlu1 %v119_v39, %s450_s11  ;;  %vm587_vm11 = vmand %vm210_vm9, %vm212_vm10  ;;  %vm645_vm9 = vcmp.ge.s32.totalorder %v298_v30, 32  ;;  %vm314_vm10 = vcmp.lt.s32.totalorder %v298_v30, 64 }
  0xf7   :  { %vm607_vm15 = vmand %vm260_vm12, %vm262_vm13 }
  0xf8   :  { %vm316_vm12 = vmand %vm645_vm9, %vm314_vm10 }
  0xfa   :  { %127 = vrot.lane.b32.xlu1 %v120_v41, %s450_s11 }
 0x164   :  { %v122_v43 = vpop.permute.xlu0 %121 }
 0x168   :  { %v126_v47 = vpop.permute.xlu0 %125  ;;  %v124_v48 = vpop.permute.xlu1 %123 }
 0x169   :  { %v130_v50 = vsel %vm129_vm0, %v122_v43, %v126_v47  ;;  %v132_v52 = vsel %vm129_vm0, %v126_v47, %v122_v43  ;;  %v342_v43 = vand.u32 255, %v471_v5 }
 0x16a   :  { %v168_v51 = vsel %vm162_vm1, %v130_v50, %v117_v34  ;;  %v169_v55 = vsel %vm163_vm4, %v132_v52, %v118_v38 }
 0x16b   :  { %172 = vrot.lane.b32.xlu0 %v168_v51, %s451_s12  ;;  %vm362_vm13 = vcmp.ge.s32.totalorder %v342_v43, 64 }
 0x16c   :  { %v128_v53 = vpop.permute.xlu1 %127 }
 0x16d   :  { %v131_v54 = vsel %vm129_vm0, %v124_v48, %v128_v53  ;;  %v133_v57 = vsel %vm129_vm0, %v128_v53, %v124_v48  ;;  %vm261_vm0 = vcmp.ge.s32.totalorder %v247_v15, 16 }
 0x16e   :  { %v170_v56 = vsel %vm162_vm1, %v131_v54, %v119_v39  ;;  %v171_v58 = vsel %vm163_vm4, %v133_v57, %v120_v41  ;;  %vm263_vm1 = vcmp.lt.s32.totalorder %v247_v15, 32  ;;  %vm313_vm4 = vcmp.lt.s32.totalorder %v471_v5, 64 }
 0x16f   :  { %176 = vrot.lane.b32.xlu0 %v169_v55, %s451_s12  ;;  %174 = vrot.lane.b32.xlu1 %v170_v56, %s451_s12  ;;  %vm618_vm2 = vmand %vm261_vm0, %vm263_vm1 }
 0x170   :  { %vm641_vm6 = vmand %vm311_vm3, %vm313_vm4 }
 0x173   :  { %178 = vrot.lane.b32.xlu1 %v171_v58, %s451_s12 }
 0x1dd   :  { %v173_v60 = vpop.permute.xlu0 %172 }
 0x1e1   :  { %v177_v63 = vpop.permute.xlu0 %176  ;;  %v175_v0 = vpop.permute.xlu1 %174 }
 0x1e2   :  { %v181_v1 = vsel %vm180_vm7, %v173_v60, %v177_v63  ;;  %v183_v3 = vsel %vm180_vm7, %v177_v63, %v173_v60 }
 0x1e3   :  { %v219_v2 = vsel %vm576_vm8, %v181_v1, %v168_v51  ;;  %v220_v9 = vsel %vm587_vm11, %v183_v3, %v169_v55 }
 0x1e4   :  { %223 = vrot.lane.b32.xlu0 %v219_v2, %s452_s13 }
 0x1e5   :  { %v179_v6 = vpop.permute.xlu1 %178 }
 0x1e6   :  { %v182_v8 = vsel %vm180_vm7, %v175_v0, %v179_v6  ;;  %v184_v11 = vsel %vm180_vm7, %v179_v6, %v175_v0 }
 0x1e7   :  { %v221_v10 = vsel %vm576_vm8, %v182_v8, %v170_v56  ;;  %v222_v12 = vsel %vm587_vm11, %v184_v11, %v171_v58 }
 0x1e8   :  { %227 = vrot.lane.b32.xlu0 %v220_v9, %s452_s13  ;;  %225 = vrot.lane.b32.xlu1 %v221_v10, %s452_s13 }
 0x1ec   :  { %229 = vrot.lane.b32.xlu1 %v222_v12, %s452_s13 }
 0x256   :  { %v224_v14 = vpop.permute.xlu0 %223 }
 0x25a   :  { %v228_v17 = vpop.permute.xlu0 %227  ;;  %v226_v18 = vpop.permute.xlu1 %225 }
 0x25b   :  { %v232_v19 = vsel %vm231_vm14, %v224_v14, %v228_v17  ;;  %v234_v21 = vsel %vm231_vm14, %v228_v17, %v224_v14 }
 0x25c   :  { %v270_v20 = vsel %vm607_vm15, %v232_v19, %v219_v2  ;;  %v271_v25 = vsel %vm618_vm2, %v234_v21, %v220_v9 }
 0x25d   :  { %274 = vrot.lane.b32.xlu0 %v270_v20, %s453_s14 }
 0x25e   :  { %v230_v23 = vpop.permute.xlu1 %229 }
 0x25f   :  { %v233_v24 = vsel %vm231_vm14, %v226_v18, %v230_v23  ;;  %v235_v27 = vsel %vm231_vm14, %v230_v23, %v226_v18 }
 0x260   :  { %v272_v26 = vsel %vm607_vm15, %v233_v24, %v221_v10  ;;  %v273_v28 = vsel %vm618_vm2, %v235_v27, %v222_v12 }
 0x261   :  { %278 = vrot.lane.b32.xlu0 %v271_v25, %s453_s14  ;;  %276 = vrot.lane.b32.xlu1 %v272_v26, %s453_s14 }
 0x265   :  { %280 = vrot.lane.b32.xlu1 %v273_v28, %s453_s14 }
 0x2cf   :  { %v275_v29 = vpop.permute.xlu0 %274 }
 0x2d3   :  { %v279_v32 = vpop.permute.xlu0 %278  ;;  %v277_v33 = vpop.permute.xlu1 %276 }
 0x2d4   :  { %v283_v35 = vsel %vm282_vm5, %v275_v29, %v279_v32  ;;  %v285_v36 = vsel %vm282_vm5, %v279_v32, %v275_v29 }
 0x2d5   :  { %v321_v7 = vsel %vm641_vm6, %v283_v35, %v270_v20  ;;  %v322_v39 = vsel %vm316_vm12, %v285_v36, %v271_v25 }
 0x2d6   :  { %325 = vrot.lane.b32.xlu0 %v321_v7, %s454_s15 }
 0x2d7   :  { %v281_v37 = vpop.permute.xlu1 %280 }
 0x2d8   :  { %v284_v38 = vsel %vm282_vm5, %v277_v33, %v281_v37  ;;  %v286_v41 = vsel %vm282_vm5, %v281_v37, %v277_v33 }
 0x2d9   :  { %v323_v40 = vsel %vm641_vm6, %v284_v38, %v272_v26  ;;  %v324_v42 = vsel %vm316_vm12, %v286_v41, %v273_v28 }
 0x2da   :  { %329 = vrot.lane.b32.xlu0 %v322_v39, %s454_s15  ;;  %327 = vrot.lane.b32.xlu1 %v323_v40, %s454_s15 }
 0x2de   :  { %331 = vrot.lane.b32.xlu1 %v324_v42, %s454_s15 }
 0x348   :  { %v326_v44 = vpop.permute.xlu0 %325 }
 0x34c   :  { %v330_v45 = vpop.permute.xlu0 %329  ;;  %v328_v46 = vpop.permute.xlu1 %327 }
 0x34d   :  { %v334_v47 = vsel %vm313_vm4, %v326_v44, %v330_v45 }
 0x34e   :  { %v372_v48 = vsel %vm362_vm13, %v334_v47, %v321_v7 }
 0x34f   :  { %376 = vrot.lane.b32.xlu0 %v372_v48, %s451_s12 }
 0x350   :  { %v332_v49 = vpop.permute.xlu1 %331 }
 0x351   :  { %v335_v50 = vsel %vm313_vm4, %v328_v46, %v332_v49 }
 0x352   :  { %v374_v51 = vsel %vm362_vm13, %v335_v50, %v323_v40 }
 0x353   :  { %380 = vrot.lane.b32.xlu0 %v322_v39, %s451_s12  ;;  %378 = vrot.lane.b32.xlu1 %v374_v51, %s451_s12 }
 0x357   :  { %382 = vrot.lane.b32.xlu1 %v324_v42, %s451_s12 }
 0x3c1   :  { %v377_v52 = vpop.permute.xlu0 %376 }
 0x3c5   :  { %v381_v53 = vpop.permute.xlu0 %380  ;;  %v379_v54 = vpop.permute.xlu1 %378 }
 0x3c6   :  { %v384_v55 = vsel %vm180_vm7, %v377_v52, %v381_v53  ;;  %v386_v57 = vsel %vm180_vm7, %v381_v53, %v377_v52 }
 0x3c7   :  { %v388_v56 = vsel %vm576_vm8, %v384_v55, %v372_v48  ;;  %v389_v60 = vsel %vm587_vm11, %v386_v57, %v322_v39 }
 0x3c8   :  { %392 = vrot.lane.b32.xlu0 %v388_v56, %s452_s13 }
 0x3c9   :  { %v383_v58 = vpop.permute.xlu1 %382 }
 0x3ca   :  { %v385_v59 = vsel %vm180_vm7, %v379_v54, %v383_v58  ;;  %v387_v63 = vsel %vm180_vm7, %v383_v58, %v379_v54  ;;  %vm426_vm7 = vcmask 1041408  }
 0x3cb   :  { %v390_v61 = vsel %vm576_vm8, %v385_v59, %v374_v51  ;;  %v391_v0 = vsel %vm587_vm11, %v387_v63, %v324_v42  ;;  %vm429_vm8 = vcmask 1045504   ;;  %vm432_vm11 = vcmask 523264  }
 0x3cc   :  { %396 = vrot.lane.b32.xlu0 %v389_v60, %s452_s13  ;;  %394 = vrot.lane.b32.xlu1 %v390_v61, %s452_s13 }
 0x3d0   :  { %398 = vrot.lane.b32.xlu1 %v391_v0, %s452_s13 }
 0x43a   :  { %v393_v1 = vpop.permute.xlu0 %392 }
 0x43e   :  { %v397_v2 = vpop.permute.xlu0 %396  ;;  %v395_v3 = vpop.permute.xlu1 %394 }
 0x43f   :  { %v400_v6 = vsel %vm231_vm14, %v393_v1, %v397_v2  ;;  %v402_v8 = vsel %vm231_vm14, %v397_v2, %v393_v1 }
 0x440   :  { %v404_v62 = vsel %vm607_vm15, %v400_v6, %v388_v56  ;;  %v405_v10 = vsel %vm618_vm2, %v402_v8, %v389_v60 }
 0x441   :  { %408 = vrot.lane.b32.xlu0 %v404_v62, %s453_s14 }
 0x442   :  { %v399_v9 = vpop.permute.xlu1 %398 }
 0x443   :  { %v401_v4 = vsel %vm231_vm14, %v395_v3, %v399_v9  ;;  %v403_v12 = vsel %vm231_vm14, %v399_v9, %v395_v3 }
 0x444   :  { %v406_v11 = vsel %vm607_vm15, %v401_v4, %v390_v61  ;;  %v407_v13 = vsel %vm618_vm2, %v403_v12, %v391_v0 }
 0x445   :  { %412 = vrot.lane.b32.xlu0 %v405_v10, %s453_s14  ;;  %410 = vrot.lane.b32.xlu1 %v406_v11, %s453_s14 }
 0x449   :  { %414 = vrot.lane.b32.xlu1 %v407_v13, %s453_s14 }
 0x4b3   :  { %v409_v14 = vpop.permute.xlu0 %408 }
 0x4b7   :  { %v413_v15 = vpop.permute.xlu0 %412  ;;  %v411_v17 = vpop.permute.xlu1 %410 }
 0x4b8   :  { %v416_v18 = vsel %vm282_vm5, %v409_v14, %v413_v15 }
 0x4b9   :  { %v418_v16 = vsel %vm641_vm6, %v416_v18, %v404_v62 }
 0x4ba   :  { %v422_v19 = vrot.slane %v418_v16, 6 }
 0x4bb   :  { %v415_v20 = vpop.permute.xlu1 %414 }
 0x4bc   :  { %v427_v21 = vsel %vm426_vm7, 0.0, %v422_v19  ;;  %v417_v22 = vsel %vm282_vm5, %v411_v17, %v415_v20 }
 0x4bd   :  { %v430_v23 = vsel %vm429_vm8, %v427_v21, 0.0  ;;  %v419_v24 = vsel %vm641_vm6, %v417_v22, %v406_v11 }
 0x4be   :  { %433 = vst.msk [vmem:[%s727_s1] sm:$0xff] %vm432_vm11, %v430_v23  ;;  %v423_v25 = vrot.slane %v419_v24, 6 }
 0x4c0   :  { %v428_v26 = vsel %vm426_vm7, 0.0, %v423_v25 }
 0x4c1   :  { %v431_v27 = vsel %vm429_vm8, %v428_v26, 0.0 }
 0x4c2   :  { %434 = vst.msk [vmem:[%s727_s1 + $0x8] sm:$0xff] %vm432_vm11, %v431_v27 }

</bundles_post_ra>
